<compile_context>
chip_gen: v7x
topology: tpu7x:2x2x1
jax: 0.10.0
libtpu: 0.0.40
codegen_flags: <defaults>
</compile_context>

<pallas_src>
import math

import jax
import jax.numpy as jnp
from jax.experimental import pallas as pl
from jax.experimental.pallas import tpu as pltpu

_LANE = 128


def _round_up(x, m):
    return ((x + m - 1) // m) * m


def _make_disc_kernel(num_layers):
    """Fused MLP kernel, batch-on-lanes layout.

    refs = (x_ref, W1, b1, ..., W_{L-1}, b_{L-1}, wL_col, bL, out_ref)
      x_ref:  (input_dim, tb)               (stream dtype)
      Wi:     (out_i, in_i)  pre-transposed (stream dtype)
      bi:     (out_i, 1)                    f32
      wL_col: (h_{L-1}, 1)                  f32 (last Linear's weight column)
      bL:     (1, 1)                        f32
      out:    (1, tb)                       f32
    """

    def kernel(*refs):
        x_ref = refs[0]
        o_ref = refs[-1]
        h = x_ref[...]                                          # (in, tb)
        for i in range(num_layers - 1):
            w = refs[1 + 2 * i][...]                            # (out, in)
            b = refs[2 + 2 * i][...]                            # (out, 1) f32
            h = jnp.dot(w, h, preferred_element_type=jnp.float32) + b
            h = jnp.maximum(h, 0.0)                             # nn.ReLU()
        # Final layer (out width == 1): VPU multiply + sublane reduction ->
        # lane-dense (1, tb) row. All-f32 elementwise (v5e-safe).
        w_col = refs[1 + 2 * (num_layers - 1)][...]             # (hk, 1) f32
        b_last = refs[2 + 2 * (num_layers - 1)][...]            # (1, 1)  f32
        h = jnp.sum(h * w_col, axis=0, keepdims=True) + b_last  # (1, tb)
        o_ref[...] = jax.nn.sigmoid(h).astype(o_ref.dtype)      # activation_func

    return kernel


def discriminator_forward(x, params, *, block_rows=8192, stream_dtype=jnp.bfloat16):
    """Run the fused Discriminator MLP as a single batch-tiled Pallas kernel.

    x:            (batch, input_dim) float32
    params:       list of (W, b); W: (in, out), b: (1, out); last out == 1
    block_rows:   target batch-tile size (rounded to a multiple of 128,
                  clamped by the per-generation VMEM budget and by the
                  >=2-grid-steps rule for v7x megacore)
    stream_dtype: dtype used to stream x and the hidden weights from HBM
                  (default bf16; accumulation is f32). Use jnp.float32 for
                  the exact path, or None to use x.dtype.
    """
    num_layers = len(params)
    batch, input_dim = x.shape
    out_dim = params[-1][0].shape[1]
    assert out_dim == 1, "Discriminator head must have width 1"

    in_dtype = jnp.dtype(stream_dtype) if stream_dtype is not None else jnp.dtype(x.dtype)
    itemsize = in_dtype.itemsize
    f32 = 4
    widths = [w.shape[1] for (w, _) in params]
    max_width = max([input_dim] + widths)

    # ---- per-generation VMEM budget (v5e/v6e: 128 MiB, v7x: 64 MiB per TC).
    try:
        vmem_cap = int(getattr(pltpu.get_tpu_info(), "vmem_capacity_bytes", 64 << 20))
    except Exception:  # non-TPU / query unavailable -> conservative (v7x) cap
        vmem_cap = 64 << 20
    budget = int(0.75 * vmem_cap)  # ~25% headroom

    # ---- batch tiling along the lane axis (multiple of 128).
    # Bytes per batch column in VMEM: double-buffered x tile + out tile +
    # per-layer activation temps (generous).
    per_col = 2 * input_dim * itemsize + 2 * f32 + 4 * max_width * f32
    tb_cap = max(_LANE, ((budget // 2) // per_col) // _LANE * _LANE)
    tb = min(_round_up(max(block_rows, _LANE), _LANE), tb_cap)

    padded128 = _round_up(batch, _LANE)
    tb = min(tb, padded128)
    if padded128 >= 2 * _LANE:
        # keep >= 2 grid steps so v7x's two TensorCores both get work
        tb = min(tb, max(_LANE, (padded128 // 2) // _LANE * _LANE))
    padded_batch = _round_up(batch, tb)
    grid = (padded_batch // tb,)

    # ---- operands: transposed x (input_dim, padded_batch); weights (out, in);
    # biases as columns; last layer weight as an f32 column (cast in wrapper,
    # not in the kernel).
    x_p = jnp.pad(x, ((0, padded_batch - batch), (0, 0)))
    flat_inputs = [x_p.T.astype(in_dtype)]
    in_specs = [pl.BlockSpec((input_dim, tb), lambda i: (0, i))]
    # NOTE: if the x DMA were still exposed at large input_dim, deepen its
    # pipeline (pl.Buffered(3)); unnecessary at these shapes.
    for li, (w, b) in enumerate(params):
        if li == num_layers - 1:
            wt = w.astype(jnp.float32)                # (hk, 1) column, f32
        else:
            wt = w.T.astype(in_dtype)                 # (out, in)
        bt = b.reshape(-1, 1).astype(jnp.float32)     # (out, 1)
        flat_inputs.append(wt)
        flat_inputs.append(bt)
        # Full-array blocks with constant index_map -> DMA'd once, VMEM-resident.
        in_specs.append(pl.BlockSpec(wt.shape, lambda i: (0, 0)))
        in_specs.append(pl.BlockSpec(bt.shape, lambda i: (0, 0)))

    # Lane-dense output row: (1, padded_batch) with (1, tb) blocks.
    out_spec = pl.BlockSpec((1, tb), lambda i: (0, i))
    out_shape = jax.ShapeDtypeStruct((1, padded_batch), jnp.float32)

    # ---- VMEM limit: double-buffered x/out tiles + resident weights + temps.
    param_bytes = sum(
        int(w.size) * (f32 if li == num_layers - 1 else itemsize) + int(b.size) * f32
        for li, (w, b) in enumerate(params)
    )
    est = (2 * tb * input_dim * itemsize      # double-buffered x tile
           + 2 * tb * f32                     # double-buffered out tile
           + 2 * param_bytes                  # resident weights (double-buffered)
           + 4 * tb * max_width * f32)        # per-layer activation temps
    vmem_bytes = int(min(max(est + (2 << 20), 8 << 20), budget))

    # ---- advisory cost estimate (matches transposed / lane-dense layout).
    flops = 0
    d = input_dim
    for wd in widths:
        flops += 2 * padded_batch * d * wd
        d = wd
    cost = pl.CostEstimate(
        flops=flops,
        transcendentals=padded_batch,                 # sigmoid exp per column
        bytes_accessed=(padded_batch * input_dim * itemsize   # x read (stream dtype)
                        + param_bytes                          # weights/biases read once
                        + padded_batch * f32),                 # lane-dense f32 output row
    )

    kernel = _make_disc_kernel(num_layers)
    out = pl.pallas_call(
        kernel,
        out_shape=out_shape,
        grid=grid,
        in_specs=in_specs,
        out_specs=out_spec,
        compiler_params=pltpu.CompilerParams(
            dimension_semantics=("parallel",),        # megacore sharding on v7x
            vmem_limit_bytes=vmem_bytes,
        ),
        cost_estimate=cost,
    )(*flat_inputs)
    return out[0, :batch][:, None]                    # back to (batch, 1)


def init_discriminator_params(key, input_dim, hidden_size):
    """Deterministic init mimicking nn.Linear.reset_parameters():
    W, b ~ U(-1/sqrt(fan_in), 1/sqrt(fan_in)). W stored as (in, out)."""
    sizes = list(hidden_size) + [1]                   # hidden_size.append(1) in __init__
    params = []
    in_dim = input_dim
    for out_dim in sizes:
        key, kw, kb = jax.random.split(key, 3)
        bound = 1.0 / math.sqrt(in_dim)
        w = jax.random.uniform(kw, (in_dim, out_dim), jnp.float32, -bound, bound)
        b = jax.random.uniform(kb, (1, out_dim), jnp.float32, -bound, bound)
        params.append((w, b))
        in_dim = out_dim
    return params


def _reference_forward(x, params):
    """Pure-JAX reference for correctness checking."""
    h = x
    n = len(params)
    for i, (w, b) in enumerate(params):
        h = h @ w + b
        h = jnp.maximum(h, 0.0) if i < n - 1 else jax.nn.sigmoid(h)
    return h


if __name__ == "__main__":
    key = jax.random.PRNGKey(0)
    k_x, k_p, k_x2 = jax.random.split(key, 3)

    input_dim = 16
    hidden_size = [32, 32]
    params = init_discriminator_params(k_p, input_dim, hidden_size)

    # Case 1: small batch, exact f32 streaming path.
    x = jax.random.normal(k_x, (8, input_dim), jnp.float32)
    ref = _reference_forward(x, params)
    out = jax.block_until_ready(
        discriminator_forward(x, params, stream_dtype=jnp.float32))
    assert out.shape == (8, 1), out.shape
    assert jnp.allclose(out, ref, atol=1e-5, rtol=1e-5), "f32 mismatch vs reference"

    # Case 2: ragged batch with a multi-step grid (exercises lane-axis tiling,
    # tail padding, >=2 grid steps), exact f32 path.
    x2 = jax.random.normal(k_x2, (300, input_dim), jnp.float32)
    ref2 = _reference_forward(x2, params)
    out2 = jax.block_until_ready(
        discriminator_forward(x2, params, block_rows=128, stream_dtype=jnp.float32))
    assert out2.shape == (300, 1), out2.shape
    assert jnp.allclose(out2, ref2, atol=1e-5, rtol=1e-5), "tiled/ragged mismatch"

    # Case 3: default bf16 streaming of x / hidden weights (HBM-bound fast path),
    # f32 accumulation and f32 head.
    out3 = jax.block_until_ready(discriminator_forward(x, params))
    assert out3.shape == (8, 1), out3.shape
    assert jnp.allclose(out3, ref, atol=5e-2), "bf16 streaming mismatch"

    print("KERNEL_OK")
</pallas_src>

<mosaic_0001>
module attributes {stable_mosaic.version = 11 : i64} {
  func.func @kernel(%arg0: i32, %arg1: memref<16x128xf32, #tpu.memory_space<vmem>>, %arg2: memref<32x16xf32, #tpu.memory_space<vmem>>, %arg3: memref<32x1xf32, #tpu.memory_space<vmem>>, %arg4: memref<32x32xf32, #tpu.memory_space<vmem>>, %arg5: memref<32x1xf32, #tpu.memory_space<vmem>>, %arg6: memref<32x1xf32, #tpu.memory_space<vmem>>, %arg7: memref<1x1xf32, #tpu.memory_space<vmem>>, %arg8: memref<1x128xf32, #tpu.memory_space<vmem>>) attributes {dimension_semantics = [#tpu.dimension_semantics<parallel>], iteration_bounds = array<i64: 1>, scalar_prefetch = 0 : i64, scratch_operands = 0 : i64, tpu.core_type = #tpu.core_type<tc>, window_params = [{transform_indices = @transform_0, window_bounds = array<i64: 16, 128>}, {pipeline_mode = #tpu.pipeline_mode<synchronous>, transform_indices = @transform_1, window_bounds = array<i64: 32, 16>}, {pipeline_mode = #tpu.pipeline_mode<synchronous>, transform_indices = @transform_2, window_bounds = array<i64: 32, 1>}, {pipeline_mode = #tpu.pipeline_mode<synchronous>, transform_indices = @transform_3, window_bounds = array<i64: 32, 32>}, {pipeline_mode = #tpu.pipeline_mode<synchronous>, transform_indices = @transform_4, window_bounds = array<i64: 32, 1>}, {pipeline_mode = #tpu.pipeline_mode<synchronous>, transform_indices = @transform_5, window_bounds = array<i64: 32, 1>}, {pipeline_mode = #tpu.pipeline_mode<synchronous>, transform_indices = @transform_6, window_bounds = array<i64: 1, 1>}, {transform_indices = @transform_7, window_bounds = array<i64: 1, 128>}]} {
    %c0 = arith.constant 0 : index
    %c0_0 = arith.constant 0 : index
    %0 = vector.load %arg1[%c0, %c0_0] : memref<16x128xf32, #tpu.memory_space<vmem>>, vector<16x128xf32>
    %c0_1 = arith.constant 0 : index
    %c0_2 = arith.constant 0 : index
    %1 = vector.load %arg2[%c0_1, %c0_2] : memref<32x16xf32, #tpu.memory_space<vmem>>, vector<32x16xf32>
    %c0_3 = arith.constant 0 : index
    %c0_4 = arith.constant 0 : index
    %2 = vector.load %arg3[%c0_3, %c0_4] : memref<32x1xf32, #tpu.memory_space<vmem>>, vector<32x1xf32>
    %cst = arith.constant dense<0.000000e+00> : vector<32x128xf32>
    %3 = tpu.matmul %1, %0, %cst {dimension_numbers = #tpu.dot_dimension_numbers<[1], [0], [0], [1], [0, 0, 1, 1], [], []>} : vector<32x16xf32>, vector<16x128xf32>, vector<32x128xf32> -> vector<32x128xf32>
    %4 = vector.broadcast %2 : vector<32x1xf32> to vector<32x128xf32>
    %5 = arith.addf %3, %4 : vector<32x128xf32>
    %cst_5 = arith.constant 0.000000e+00 : f32
    %6 = vector.broadcast %cst_5 : f32 to vector<32x128xf32>
    %7 = arith.maximumf %5, %6 : vector<32x128xf32>
    %c0_6 = arith.constant 0 : index
    %c0_7 = arith.constant 0 : index
    %8 = vector.load %arg4[%c0_6, %c0_7] : memref<32x32xf32, #tpu.memory_space<vmem>>, vector<32x32xf32>
    %c0_8 = arith.constant 0 : index
    %c0_9 = arith.constant 0 : index
    %9 = vector.load %arg5[%c0_8, %c0_9] : memref<32x1xf32, #tpu.memory_space<vmem>>, vector<32x1xf32>
    %cst_10 = arith.constant dense<0.000000e+00> : vector<32x128xf32>
    %10 = tpu.matmul %8, %7, %cst_10 {dimension_numbers = #tpu.dot_dimension_numbers<[1], [0], [0], [1], [0, 0, 1, 1], [], []>} : vector<32x32xf32>, vector<32x128xf32>, vector<32x128xf32> -> vector<32x128xf32>
    %11 = vector.broadcast %9 : vector<32x1xf32> to vector<32x128xf32>
    %12 = arith.addf %10, %11 : vector<32x128xf32>
    %cst_11 = arith.constant 0.000000e+00 : f32
    %13 = vector.broadcast %cst_11 : f32 to vector<32x128xf32>
    %14 = arith.maximumf %12, %13 : vector<32x128xf32>
    %c0_12 = arith.constant 0 : index
    %c0_13 = arith.constant 0 : index
    %15 = vector.load %arg6[%c0_12, %c0_13] : memref<32x1xf32, #tpu.memory_space<vmem>>, vector<32x1xf32>
    %c0_14 = arith.constant 0 : index
    %c0_15 = arith.constant 0 : index
    %16 = vector.load %arg7[%c0_14, %c0_15] : memref<1x1xf32, #tpu.memory_space<vmem>>, vector<1x1xf32>
    %17 = vector.broadcast %15 : vector<32x1xf32> to vector<32x128xf32>
    %18 = arith.mulf %14, %17 : vector<32x128xf32>
    %cst_16 = arith.constant dense<0.000000e+00> : vector<128xf32>
    %19 = vector.multi_reduction <add>, %18, %cst_16 [0] : vector<32x128xf32> to vector<128xf32>
    %20 = vector.shape_cast %19 : vector<128xf32> to vector<1x128xf32>
    %21 = vector.broadcast %16 : vector<1x1xf32> to vector<1x128xf32>
    %22 = arith.addf %20, %21 : vector<1x128xf32>
    %23 = arith.negf %22 : vector<1x128xf32>
    %24 = math.exp %23 : vector<1x128xf32>
    %cst_17 = arith.constant 1.000000e+00 : f32
    %25 = vector.broadcast %cst_17 : f32 to vector<1x128xf32>
    %26 = arith.addf %25, %24 : vector<1x128xf32>
    %27 = arith.divf %25, %26 : vector<1x128xf32>
    %c0_18 = arith.constant 0 : index
    %c0_19 = arith.constant 0 : index
    %28 = vector.load %arg8[%c0_18, %c0_19] : memref<1x128xf32, #tpu.memory_space<vmem>>, vector<1x128xf32>
    tpu.vector_store %arg8[%c0_18, %c0_19], %27 {strides = array<i32>} : memref<1x128xf32, #tpu.memory_space<vmem>>, vector<1x128xf32>,
    return
  }
  func.func @transform_0(%arg0: i32) -> (i32, i32) {
    %c0_i32 = arith.constant 0 : i32
    %c0_i32_0 = arith.constant 0 : i32
    return %c0_i32, %arg0 : i32, i32
  }
  func.func @transform_1(%arg0: i32) -> (i32, i32) {
    %c0_i32 = arith.constant 0 : i32
    %c0_i32_0 = arith.constant 0 : i32
    %c0_i32_1 = arith.constant 0 : i32
    return %c0_i32, %c0_i32_0 : i32, i32
  }
  func.func @transform_2(%arg0: i32) -> (i32, i32) {
    %c0_i32 = arith.constant 0 : i32
    %c0_i32_0 = arith.constant 0 : i32
    %c0_i32_1 = arith.constant 0 : i32
    return %c0_i32, %c0_i32_0 : i32, i32
  }
  func.func @transform_3(%arg0: i32) -> (i32, i32) {
    %c0_i32 = arith.constant 0 : i32
    %c0_i32_0 = arith.constant 0 : i32
    %c0_i32_1 = arith.constant 0 : i32
    return %c0_i32, %c0_i32_0 : i32, i32
  }
  func.func @transform_4(%arg0: i32) -> (i32, i32) {
    %c0_i32 = arith.constant 0 : i32
    %c0_i32_0 = arith.constant 0 : i32
    %c0_i32_1 = arith.constant 0 : i32
    return %c0_i32, %c0_i32_0 : i32, i32
  }
  func.func @transform_5(%arg0: i32) -> (i32, i32) {
    %c0_i32 = arith.constant 0 : i32
    %c0_i32_0 = arith.constant 0 : i32
    %c0_i32_1 = arith.constant 0 : i32
    return %c0_i32, %c0_i32_0 : i32, i32
  }
  func.func @transform_6(%arg0: i32) -> (i32, i32) {
    %c0_i32 = arith.constant 0 : i32
    %c0_i32_0 = arith.constant 0 : i32
    %c0_i32_1 = arith.constant 0 : i32
    return %c0_i32, %c0_i32_0 : i32, i32
  }
  func.func @transform_7(%arg0: i32) -> (i32, i32) {
    %c0_i32 = arith.constant 0 : i32
    %c0_i32_0 = arith.constant 0 : i32
    return %c0_i32, %arg0 : i32, i32
  }
}

</mosaic_0001>

<bundles_post_ra>
// kernel: tpu_custom_call.1
= control target key start
LH: loop header
LB: loop body
LE: loop exit
PB: predicated region body
PF: predicated region fallthrough
CT: control target
= control target key end

     0   :  { %s582_s0 = inlined_call_operand.vmem [shape: f32[16,128], index: 0, kind: input, shape index: {}]   ;;  %s583_s1 = inlined_call_operand.vmem [shape: f32[32,16], index: 1, kind: input, shape index: {}]   ;;  %s584_s2 = inlined_call_operand.vmem [shape: f32[32,1], index: 2, kind: input, shape index: {}]   ;;  %s585_s3 = inlined_call_operand.vmem [shape: f32[32,32], index: 3, kind: input, shape index: {}]   ;;  %s586_s4 = inlined_call_operand.vmem [shape: f32[32,1], index: 4, kind: input, shape index: {}]   ;;  %s587_s5 = inlined_call_operand.vmem [shape: f32[32,1], index: 5, kind: input, shape index: {}]   ;;  %s588_s6 = inlined_call_operand.<no memory space> [shape: f32[1,1], index: 6, kind: input, shape index: {}]   ;;  %s589_s7 = inlined_call_operand.hbm [shape: f32[1,128], index: 7, kind: output, shape index: {}]  }
   0x1   :  { %v12_v0 = vstv %s588_s6 }
   0x2   :  { %13 = vst [vmem:[#allocation2] sm:$0x1] %v12_v0 }
   0x3   :  { %v29_v1 = vld [vmem:[%s582_s0] sm:$0xff]  ;;  %v30_v2 = vld [vmem:[%s582_s0 + $0x8] sm:$0xff]  ;;  %vm59_vm0 = vcmask 130048   ;;  %v451_v5 = vmov 0   ;;  %v37_v7 = vld [vmem:[%s584_s2 + $0x10] sm:$0xff] }
   0x4   :  { %v31_v3 = vld [vmem:[%s583_s1] sm:$0xff]  ;;  %v407_v4 = vpack.c.bf16 %v30_v2, %v29_v1  ;;  %421 = vset.pattern.permute.xlu0 %v451_v5  ;;  %422 = vset.pattern.permute.xlu1 %v451_v5  ;;  %v32_v8 = vld [vmem:[%s583_s1 + $0x8] sm:$0xff]  ;;  %v33_v10 = vld [vmem:[%s583_s1 + $0x10] sm:$0xff] }
   0x5   :  { %387 = vmatprep.mubr.msk.f32.mxu0 %vm59_vm0, %v31_v3  ;;  %v35_v6 = vld [vmem:[%s584_s2] sm:$0xff]  ;;  %v36_v9 = vld [vmem:[%s584_s2 + $0x8] sm:$0xff]  ;;  %51 = vperm.xlu1 %422, %v37_v7   ;;  %v38_v11 = vld [vmem:[%s584_s2 + $0x18] sm:$0xff] }
   0x6   :  { %408 = vmatprep.subr.bf16.mxu0 %v407_v4  ;;  %41 = vperm.xlu0 %421, %v35_v6  }
   0x7   :  { %410 = vmatpush3.bf16.msra.mxu0 %v407_v4 }
   0x8   :  { %14 = vsyncpa [#allocation4], 0  ;;  %v34_v12 = vld [vmem:[%s583_s1 + $0x18] sm:$0xff]  ;;  %v165_v13 = vld [vmem:[%s586_s4] sm:$0xff]  ;;  %vm189_vm1 = vcmask 261120   ;;  %v334_v6 = vlaneseq }
   0x9   :  { %56 = vperm.xlu1 %422, %v38_v11   ;;  %v166_v14 = vld [vmem:[%s586_s4 + $0x8] sm:$0xff]  ;;  %v167_v15 = vld [vmem:[%s586_s4 + $0x10] sm:$0xff]  ;;  %v168_v16 = vld [vmem:[%s586_s4 + $0x18] sm:$0xff] }
   0xa   :  { %388 = vmatmul.mubr.msk.f32.vlgmr.msra.gmra.mrb[0].mxu0 %vm59_vm0, %v32_v8  ;;  %46 = vperm.xlu0 %421, %v36_v9   ;;  %v291_v17 = vld [vmem:[%s587_s5] sm:$0xff]  ;;  %v292_v18 = vld [vmem:[%s587_s5 + $0x8] sm:$0xff]  ;;  %v293_v19 = vld [vmem:[%s587_s5 + $0x10] sm:$0xff]  ;;  %v335_v9 = vshrl.u32 %v334_v6, 7 }
   0xb   :  { %390 = vmatprep.mubr.msk.f32.mxu0 %vm59_vm0, %v33_v10  ;;  %v294_v20 = vld [vmem:[%s587_s5 + $0x18] sm:$0xff]  ;;  %v295_v21 = vld [vmem:[#allocation2] sm:$0x1]  ;;  %v162_v41 = vld [vmem:[%s585_s3 + $0x8] sm:$0xff] }
   0xc   :  { %v161_v22 = vld [vmem:[%s585_s3] sm:$0xff]  ;;  %v163_v42 = vld [vmem:[%s585_s3 + $0x10] sm:$0xff]  ;;  %v164_v43 = vld [vmem:[%s585_s3 + $0x18] sm:$0xff]  ;;  %s452_s3 = smov [#allocation3]  }
   0xd   :  { %176 = vperm.xlu1 %422, %v166_v14   ;;  %401 = vmatprep.mubr.msk.f32.mxu1 %vm189_vm1, %v161_v22  ;;  %s352_s16 = sshll.u32 %s452_s3, 4  ;;  %s353_s16 = int_to_ptr.vmem [resolvable:$true] %s352_s16 }
   0xe   :  { %391 = vmatmul.mubr.msk.f32.gmra.mrb[2].mxu0 %vm59_vm0, %v34_v12  ;;  %171 = vperm.xlu0 %421, %v165_v13   ;;  %v336_v12 = vsub.s32 0, %v335_v9  ;;  %s427_s17 = scalar_lea.vmem %s353_s16, 16  ;;  %s431_s18 = scalar_lea.vmem %s353_s16, 32 }
   0xf   :  { %p428_p0 = scmp.ne.s32.totalorder %s353_s16, %s427_s17  ;;  %p432_p1 = scmp.lt.s32.totalorder %s353_s16, %s353_s16 }
  0x10   :  { %p433_p2 = scmp.lt.s32.totalorder %s431_s18, %s427_s17 }
  0x11   :  { %186 = vperm.xlu1 %422, %v168_v16  }
  0x12   :  { %181 = vperm.xlu0 %421, %v167_v15   ;;  %p434_p3 = por %p433_p2, %p432_p1 }
  0x14   :  { %p435_p4 = pnand %p434_p3, %p428_p0 }
  0x15   :  { %303 = vperm.xlu1 %422, %v292_v18  }
  0x16   :  { %298 = vperm.xlu0 %421, %v291_v17  }
  0x19   :  { %313 = vperm.xlu1 %422, %v294_v20  }
  0x1a   :  { %308 = vperm.xlu0 %421, %v293_v19  }
  0x1e   :  { %331 = vperm.xlu0 %421, %v295_v21  }
  0x84   :  { %v52_v24 = vpop.permute.xlu1 %51 }
  0x85   :  { %v42_v23 = vpop.permute.xlu0 %41 }
  0x88   :  { %v57_v31 = vpop.permute.xlu1 %56 }
  0x89   :  { %v47_v25 = vpop.permute.xlu0 %46 }
  0x8c   :  { %v177_v45 = vpop.permute.xlu1 %176 }
  0x8d   :  { %v172_v44 = vpop.permute.xlu0 %171 }
  0x90   :  { %v187_v47 = vpop.permute.xlu1 %186 }
  0x91   :  { %v182_v46 = vpop.permute.xlu0 %181 }
  0x94   :  { %v304_v54 = vpop.permute.xlu1 %303 }
  0x95   :  { %v299_v52 = vpop.permute.xlu0 %298 }
  0x98   :  { %v314_v3 = vpop.permute.xlu1 %313 }
  0x99   :  { %v309_v1 = vpop.permute.xlu0 %308 }
  0x9d   :  { %v332_v14 = vpop.permute.xlu0 %331 }
  0x9e   :  { %v337_v16 = vrot.slane %v332_v14, %v336_v12 }
  0xdd   :  { %v389_v26 = vpop.f32.mrb[0].mxu0 }
  0xde   :  { %v144_v27 = vadd.f32 %v389_v26, %v47_v25  ;;  %v138_v28 = vpop.f32.mrb[1].mxu0 }
  0xdf   :  { %v139_v29 = vadd.f32 %v138_v28, %v42_v23 }
  0xe0   :  { %v158_v30 = vmax.f32 %v144_v27, 0.0 }
  0xe1   :  { %v157_v32 = vmax.f32 %v139_v29, 0.0  ;;  %v392_v33 = vpop.f32.mrb[2].mxu0 }
  0xe2   :  { %v154_v34 = vadd.f32 %v392_v33, %v57_v31  ;;  %v148_v35 = vpop.f32.mrb[3].mxu0 }
  0xe3   :  { %v149_v36 = vadd.f32 %v148_v35, %v52_v24  ;;  %v411_v37 = vpack.c.bf16 %v158_v30, %v157_v32 }
  0xe4   :  { %v160_v38 = vmax.f32 %v154_v34, 0.0 }
  0xe5   :  { %v159_v39 = vmax.f32 %v149_v36, 0.0  ;;  %412 = vmatprep.subr.bf16.mxu1 %v411_v37 }
  0xe6   :  { %414 = vmatpush3.bf16.msra.mxu1 %v411_v37 }
  0xe7   :  { %v415_v40 = vpack.c.bf16 %v160_v38, %v159_v39 }
  0xe9   :  { %416 = vmatprep.subr.bf16.mxu1 %v415_v40 }
  0xea   :  { %418 = vmatpush3.bf16.msra.mxu1 %v415_v40 }
  0xed   :  { %402 = vmatmul.mubr.msk.f32.vlgmr.msra.gmra.mrb[0].mxu1 %vm189_vm1, %v162_v41 }
  0xee   :  { %404 = vmatprep.mubr.msk.f32.mxu1 %vm189_vm1, %v163_v42 }
  0xf1   :  { %405 = vmatmul.mubr.msk.f32.gmra.mrb[2].mxu1 %vm189_vm1, %v164_v43 }
 0x1c0   :  { %v403_v48 = vpop.f32.mrb[0].mxu1 }
 0x1c1   :  { %v274_v49 = vadd.f32 %v403_v48, %v177_v45  ;;  %v268_v50 = vpop.f32.mrb[1].mxu1 }
 0x1c2   :  { %v269_v51 = vadd.f32 %v268_v50, %v172_v44 }
 0x1c3   :  { %v288_v53 = vmax.f32 %v274_v49, 0.0 }
 0x1c4   :  { %v287_v55 = vmax.f32 %v269_v51, 0.0  ;;  %v406_v56 = vpop.f32.mrb[2].mxu1 }
 0x1c5   :  { %v317_v57 = vmul.f32 %v304_v54, %v288_v53  ;;  %v284_v58 = vadd.f32 %v406_v56, %v187_v47  ;;  %v278_v59 = vpop.f32.mrb[3].mxu1 }
 0x1c6   :  { %v316_v60 = vmul.f32 %v299_v52, %v287_v55  ;;  %v279_v61 = vadd.f32 %v278_v59, %v182_v46 }
 0x1c7   :  { %v290_v63 = vmax.f32 %v284_v58, 0.0 }
 0x1c8   :  { %v320_v62 = vadd.f32 %v317_v57, %v316_v60  ;;  %v289_v0 = vmax.f32 %v279_v61, 0.0 }
 0x1c9   :  { %v319_v4 = vmul.f32 %v314_v3, %v290_v63 }
 0x1ca   :  { %v318_v2 = vmul.f32 %v309_v1, %v289_v0 }
 0x1cc   :  { %v321_v5 = vadd.f32 %v320_v62, %v318_v2 }
 0x1ce   :  { %v322_v7 = vadd.f32 %v321_v5, %v319_v4 }
 0x1d0   :  { %v323_v8 = vrot.slane %v322_v7, 4 }
 0x1d2   :  { %v324_v10 = vadd.f32 %v323_v8, %v322_v7 }
 0x1d4   :  { %v325_v11 = vrot.slane %v324_v10, 2 }
 0x1d6   :  { %v326_v13 = vadd.f32 %v325_v11, %v324_v10 }
 0x1d8   :  { %v327_v15 = vrot.slane %v326_v13, 1 }
 0x1da   :  { %v328_v17 = vadd.f32 %v327_v15, %v326_v13 }
 0x1dc   :  { %v338_v18 = vadd.f32 %v337_v16, %v328_v17 }
 0x1de   :  { %v368_v19 = vmul.f32 -1.442695, %v338_v18 }
 0x1e0   :  { %423 = vpow2.f32 %v368_v19 }
 0x1ea   :  { %v424_v20 = vpop.eup %423 }
 0x1eb   :  { %v342_v21 = vadd.f32 1.0, %v424_v20 }
 0x1ed   :  { %425 = vrcp.f32 %v342_v21 }
 0x1f7   :  { %v426_v22 = vpop.eup %425 }
 0x1f8   :  { %345 = vst [vmem:[#allocation3] sm:$0x1] %v426_v22 }
 0x1f9   :  { %438 = shalt.err (!%p435_p4)
}
 0x1fa   :  { %s439_s21 = scalar_lea.hbm %s589_s7, 16 }
 0x1fb   :  { %p440_p5 = scmp.ne.s32.totalorder %s589_s7, %s439_s21  ;;  %p443_p6 = scmp.lt.u32.totalorder %s439_s21, %s589_s7 }
 0x1fd   :  { %p445_p7 = pnand %p443_p6, %p440_p5 }
 0x1ff   :  { %448 = shalt.err (!%p445_p7)
}
 0x200   :  { %355 = dma.vmem_to_hbm [thread:$0]  %s353_s16, 16, %s589_s7, [#allocation4]  }
 0x201   :  { %449 = dma.done.wait [#allocation4], 16  }
 0x202   :  { %450 = vsyncadd [#allocation4], 4294967280 }
 0x203   :  { %359 = vsyncpa [#allocation4], 1 }

</bundles_post_ra>
